<compile_context>
chip_gen: v5e
topology: v5e:2x2
jax: 0.10.0
libtpu: 0.0.40
codegen_flags: <defaults>
</compile_context>

<pallas_src>
import jax
import jax.numpy as jnp
from jax.experimental import pallas as pl
from jax.experimental.pallas import tpu as pltpu

LANES = 128          # vreg lane width
TILE_ROWS = 512      # mem-bound elementwise/reduction: large row tile


def _round_up(x, m):
    return ((x + m - 1) // m) * m


# ----------------------------------------------------------------------------
# Kernel: fused masked-L1 numerator + mask-sum denominator + final divide.
# ----------------------------------------------------------------------------
def _masked_l1_kernel(x_ref, t_ref, m_ref, o_ref, acc_ref):
    i = pl.program_id(0)

    @pl.when(i == 0)
    def _init():
        acc_ref[0] = 0.0
        acc_ref[1] = 0.0

    m = m_ref[...]
    # Literal |input*mask - target*mask| (same op order as the PyTorch module).
    diff = jnp.abs(x_ref[...] * m - t_ref[...] * m)
    acc_ref[0] += jnp.sum(diff)   # L1-sum numerator
    acc_ref[1] += jnp.sum(m)      # mask sum (denominator term)

    @pl.when(i == pl.num_programs(0) - 1)
    def _finalize():
        o_ref[0] = acc_ref[0] / (acc_ref[1] + 1.0)


def mask_one_l1_loss(inp, target, mask, *, tile_rows=TILE_ROWS):
    """Pallas implementation of MaskOneL1Loss.forward.

    inp, target, mask: arrays of identical shape (any rank).
    Returns a scalar float32 loss.
    """
    assert inp.shape == target.shape == mask.shape, "shapes must match"

    x = inp.astype(jnp.float32).reshape(-1)
    t = target.astype(jnp.float32).reshape(-1)
    m = mask.astype(jnp.float32).reshape(-1)
    n = x.shape[0]

    # Lane-dense 2D view: (rows, 128). rows padded to a multiple of 8 (sublane) and of
    # the chosen block so every block is (8,128)-aligned.
    rows = _round_up(pl.cdiv(n, LANES), 8)
    block_rows = min(tile_rows, rows)
    rows = _round_up(rows, block_rows)
    padded = rows * LANES
    if padded != n:
        pad = padded - n
        # zero padding is exact: contributes 0 to both |diff*mask| and sum(mask)
        x = jnp.pad(x, (0, pad))
        t = jnp.pad(t, (0, pad))
        m = jnp.pad(m, (0, pad))
    x = x.reshape(rows, LANES)
    t = t.reshape(rows, LANES)
    m = m.reshape(rows, LANES)

    grid = (rows // block_rows,)
    out = pl.pallas_call(
        _masked_l1_kernel,
        out_shape=jax.ShapeDtypeStruct((1,), jnp.float32),
        grid=grid,
        in_specs=[
            pl.BlockSpec((block_rows, LANES), lambda i: (i, 0)),
            pl.BlockSpec((block_rows, LANES), lambda i: (i, 0)),
            pl.BlockSpec((block_rows, LANES), lambda i: (i, 0)),
        ],
        out_specs=pl.BlockSpec(memory_space=pltpu.MemorySpace.SMEM),
        scratch_shapes=[pltpu.SMEM((2,), jnp.float32)],
        compiler_params=pltpu.CompilerParams(
            # single reduction axis -> must be sequential for the SMEM accumulators
            dimension_semantics=("arbitrary",),
        ),
    )(x, t, m)
    return out[0]


# ----------------------------------------------------------------------------
if __name__ == "__main__":
    key = jax.random.PRNGKey(0)
    k_in, k_tgt, k_mask = jax.random.split(key, 3)

    # Small shapes consistent with the module: batch=2, channels=4, spatial=16.
    shape = (2, 4, 16, 16)
    inp = jax.random.normal(k_in, shape, jnp.float32)
    target = jax.random.normal(k_tgt, shape, jnp.float32)
    mask = (jax.random.uniform(k_mask, shape) > 0.5).astype(jnp.float32)

    loss = mask_one_l1_loss(inp, target, mask)
    loss = jax.block_until_ready(loss)

    # Pure-JAX reference check (same semantics as the PyTorch module).
    ref = jnp.sum(jnp.abs(inp * mask - target * mask)) / (jnp.sum(mask) + 1.0)
    assert jnp.allclose(loss, ref, rtol=1e-5, atol=1e-6), (loss, ref)

    print("KERNEL_OK")
</pallas_src>

<mosaic_0001>
module attributes {stable_mosaic.version = 11 : i64} {
  func.func @_masked_l1_kernel(%arg0: i32, %arg1: memref<16x128xf32, #tpu.memory_space<vmem>>, %arg2: memref<16x128xf32, #tpu.memory_space<vmem>>, %arg3: memref<16x128xf32, #tpu.memory_space<vmem>>, %arg4: memref<1xf32, #tpu.memory_space<smem>>, %arg5: memref<2xf32, #tpu.memory_space<smem>>) attributes {dimension_semantics = [#tpu.dimension_semantics<arbitrary>], iteration_bounds = array<i64: 1>, scalar_prefetch = 0 : i64, scratch_operands = 1 : i64, tpu.core_type = #tpu.core_type<tc>, window_params = [{transform_indices = @transform_0, window_bounds = array<i64: 16, 128>}, {transform_indices = @transform_1, window_bounds = array<i64: 16, 128>}, {transform_indices = @transform_2, window_bounds = array<i64: 16, 128>}, {transform_indices = @transform_3, window_bounds = array<i64: 1>}]} {
    %c0_i32 = arith.constant 0 : i32
    %0 = arith.cmpi eq, %arg0, %c0_i32 : i32
    %1 = arith.extui %0 : i1 to i32
    %c0_i32_0 = arith.constant 0 : i32
    %2 = arith.cmpi ne, %1, %c0_i32_0 : i32
    scf.if %2 {
      %cst_12 = arith.constant 0.000000e+00 : f32
      %c0_13 = arith.constant 0 : index
      %27 = memref.load %arg5[%c0_13] : memref<2xf32, #tpu.memory_space<smem>>
      memref.store %cst_12, %arg5[%c0_13] : memref<2xf32, #tpu.memory_space<smem>>
      %cst_14 = arith.constant 0.000000e+00 : f32
      %c1_15 = arith.constant 1 : index
      %28 = memref.load %arg5[%c1_15] : memref<2xf32, #tpu.memory_space<smem>>
      memref.store %cst_14, %arg5[%c1_15] : memref<2xf32, #tpu.memory_space<smem>>
    } else {
    }
    %c0 = arith.constant 0 : index
    %c0_1 = arith.constant 0 : index
    %3 = vector.load %arg3[%c0, %c0_1] : memref<16x128xf32, #tpu.memory_space<vmem>>, vector<16x128xf32>
    %c0_2 = arith.constant 0 : index
    %c0_3 = arith.constant 0 : index
    %4 = vector.load %arg1[%c0_2, %c0_3] : memref<16x128xf32, #tpu.memory_space<vmem>>, vector<16x128xf32>
    %5 = arith.mulf %4, %3 : vector<16x128xf32>
    %c0_4 = arith.constant 0 : index
    %c0_5 = arith.constant 0 : index
    %6 = vector.load %arg2[%c0_4, %c0_5] : memref<16x128xf32, #tpu.memory_space<vmem>>, vector<16x128xf32>
    %7 = arith.mulf %6, %3 : vector<16x128xf32>
    %8 = arith.subf %5, %7 : vector<16x128xf32>
    %9 = math.absf %8 : vector<16x128xf32>
    %c0_6 = arith.constant 0 : index
    %10 = memref.load %arg5[%c0_6] : memref<2xf32, #tpu.memory_space<smem>>
    %11 = vector.shape_cast %9 : vector<16x128xf32> to vector<1x16x128xf32>
    %cst = arith.constant dense<0.000000e+00> : vector<1xf32>
    %12 = vector.multi_reduction <add>, %11, %cst [1, 2] : vector<1x16x128xf32> to vector<1xf32>
    %13 = vector.shape_cast %12 : vector<1xf32> to vector<1x1x1xf32>
    %14 = vector.extract %13[0, 0, 0] : f32 from vector<1x1x1xf32>
    %15 = arith.addf %10, %14 : f32
    %c0_7 = arith.constant 0 : index
    %16 = memref.load %arg5[%c0_7] : memref<2xf32, #tpu.memory_space<smem>>
    memref.store %15, %arg5[%c0_7] : memref<2xf32, #tpu.memory_space<smem>>
    %c1 = arith.constant 1 : index
    %17 = memref.load %arg5[%c1] : memref<2xf32, #tpu.memory_space<smem>>
    %18 = vector.shape_cast %3 : vector<16x128xf32> to vector<1x16x128xf32>
    %cst_8 = arith.constant dense<0.000000e+00> : vector<1xf32>
    %19 = vector.multi_reduction <add>, %18, %cst_8 [1, 2] : vector<1x16x128xf32> to vector<1xf32>
    %20 = vector.shape_cast %19 : vector<1xf32> to vector<1x1x1xf32>
    %21 = vector.extract %20[0, 0, 0] : f32 from vector<1x1x1xf32>
    %22 = arith.addf %17, %21 : f32
    %c1_9 = arith.constant 1 : index
    %23 = memref.load %arg5[%c1_9] : memref<2xf32, #tpu.memory_space<smem>>
    memref.store %22, %arg5[%c1_9] : memref<2xf32, #tpu.memory_space<smem>>
    %c0_i32_10 = arith.constant 0 : i32
    %24 = arith.cmpi eq, %arg0, %c0_i32_10 : i32
    %25 = arith.extui %24 : i1 to i32
    %c0_i32_11 = arith.constant 0 : i32
    %26 = arith.cmpi ne, %25, %c0_i32_11 : i32
    scf.if %26 {
      %c0_12 = arith.constant 0 : index
      %27 = memref.load %arg5[%c0_12] : memref<2xf32, #tpu.memory_space<smem>>
      %c1_13 = arith.constant 1 : index
      %28 = memref.load %arg5[%c1_13] : memref<2xf32, #tpu.memory_space<smem>>
      %cst_14 = arith.constant 1.000000e+00 : f32
      %29 = arith.addf %28, %cst_14 : f32
      %30 = arith.divf %27, %29 : f32
      %c0_15 = arith.constant 0 : index
      %31 = memref.load %arg4[%c0_15] : memref<1xf32, #tpu.memory_space<smem>>
      memref.store %30, %arg4[%c0_15] : memref<1xf32, #tpu.memory_space<smem>>
    } else {
    }
    return
  }
  func.func @transform_0(%arg0: i32) -> (i32, i32) {
    %c0_i32 = arith.constant 0 : i32
    %c0_i32_0 = arith.constant 0 : i32
    return %arg0, %c0_i32 : i32, i32
  }
  func.func @transform_1(%arg0: i32) -> (i32, i32) {
    %c0_i32 = arith.constant 0 : i32
    %c0_i32_0 = arith.constant 0 : i32
    return %arg0, %c0_i32 : i32, i32
  }
  func.func @transform_2(%arg0: i32) -> (i32, i32) {
    %c0_i32 = arith.constant 0 : i32
    %c0_i32_0 = arith.constant 0 : i32
    return %arg0, %c0_i32 : i32, i32
  }
  func.func @transform_3(%arg0: i32) -> i32 {
    %c0_i32 = arith.constant 0 : i32
    %c0_i32_0 = arith.constant 0 : i32
    return %c0_i32 : i32
  }
}

</mosaic_0001>

<bundles_post_ra>
// kernel: tpu_custom_call.1
= control target key start
LH: loop header
LB: loop body
LE: loop exit
PB: predicated region body
PF: predicated region fallthrough
CT: control target
= control target key end

     0   :  { %8 = vsyncpa [#allocation4], 0  ;;  %s298_s0 = inlined_call_operand.hbm [shape: f32[16,128], index: 0, kind: input, shape index: {}]   ;;  %s299_s1 = inlined_call_operand.hbm [shape: f32[16,128], index: 1, kind: input, shape index: {}]   ;;  %s300_s2 = inlined_call_operand.hbm [shape: f32[16,128], index: 2, kind: input, shape index: {}]   ;;  %s301_s3 = inlined_call_operand.hbm [shape: f32[1], index: 3, kind: output, shape index: {}]  }
   0x1   :  { %9 = vsyncpa [#allocation7], 0 }
   0x2   :  { %10 = vsyncpa [#allocation5], 0  ;;  %s28_s14 = sshll.u32 %s299_s1, 4  ;;  %s260_s15 = smov [#allocation6]   ;;  %s29_s14 = int_to_ptr.hbm [resolvable:$true] %s28_s14 }
   0x3   :  { %s30_s16 = sshll.u32 %s260_s15, 4  ;;  %s15_s19 = sshll.u32 %s298_s0, 4  ;;  %s31_s16 = int_to_ptr.vmem [resolvable:$true] %s30_s16  ;;  %s16_s19 = int_to_ptr.hbm [resolvable:$true] %s15_s19 }
   0x4   :  { %s261_s20 = smov 128   ;;  %s262_s21 = smov 8  }
   0x5   :  { %36 = dma.hbm_to_vmem [thread:$0]  %s29_s14, 256, %s31_s16, [#allocation7], %s261_s20, %s261_s20, %s262_s21  }
   0x6   :  { %s263_s22 = smov [#allocation3]   ;;  %s41_s26 = sshll.u32 %s300_s2, 4  ;;  %s42_s26 = int_to_ptr.hbm [resolvable:$true] %s41_s26 }
   0x7   :  { %s17_s23 = sshll.u32 %s263_s22, 4  ;;  %s264_s1 = smov [#allocation8]   ;;  %s18_s23 = int_to_ptr.vmem [resolvable:$true] %s17_s23 }
   0x8   :  { %23 = dma.hbm_to_vmem [thread:$0]  %s16_s19, 256, %s18_s23, [#allocation4], %s261_s20, %s261_s20, %s262_s21  }
   0x9   :  { %s43_s27 = sshll.u32 %s264_s1, 4  ;;  %s44_s27 = int_to_ptr.vmem [resolvable:$true] %s43_s27 }
   0xa   :  { %49 = dma.hbm_to_vmem [thread:$0]  %s42_s26, 256, %s44_s27, [#allocation7], %s261_s20, %s261_s20, %s262_s21  }
   0xb   :  { %254 = dma.done.wait [#allocation4], 256  }
   0xc   :  { %255 = vsyncadd [#allocation4], 4294967040 }
   0xd   :  { %256 = dma.done.wait [#allocation7], 512  }
   0xe   :  { %257 = vsyncadd [#allocation7], 4294966784  ;;  %v70_v0 = vld [vmem:[#allocation8] sm:$0xff]  ;;  %v71_v1 = vld [vmem:[#allocation8 + $0x8] sm:$0xff]  ;;  %s142_s4 = sshll.u32 %s301_s3, 4  ;;  %s265_s7 = smov [#allocation9]   ;;  %s143_s4 = int_to_ptr.hbm [resolvable:$true] %s142_s4 }
   0xf   :  { %v72_v2 = vld [vmem:[#allocation3] sm:$0xff]  ;;  %v73_v3 = vld [vmem:[#allocation3 + $0x8] sm:$0xff]  ;;  %v76_v5 = vld [vmem:[#allocation6] sm:$0xff]  ;;  %v99_v15 = vadd.f32 %v71_v1, %v70_v0 }
  0x10   :  { %v74_v4 = vmul.f32 %v72_v2, %v70_v0  ;;  %v77_v6 = vld [vmem:[#allocation6 + $0x8] sm:$0xff]  ;;  %v75_v7 = vmul.f32 %v73_v3, %v71_v1  ;;  %v78_v8 = vmul.f32 %v76_v5, %v70_v0 }
  0x11   :  { %v79_v9 = vmul.f32 %v77_v6, %v71_v1 }
  0x12   :  { %v80_v10 = vsub.f32 %v74_v4, %v78_v8 }
  0x13   :  { %v81_v11 = vsub.f32 %v75_v7, %v79_v9 }
  0x14   :  { %v82_v12 = vand.u32 2147483647, %v80_v10 }
  0x15   :  { %v83_v13 = vand.u32 2147483647, %v81_v11 }
  0x17   :  { %v85_v14 = vadd.f32 %v83_v13, %v82_v12 }
  0x19   :  { %86 = vadd.xlane.f32.xlu0 %v85_v14 }
  0x21   :  { %100 = vadd.xlane.f32.xlu0 %v99_v15 }
  0x8c   :  { %v87_v16 = vpop.xlane.xlu0 %86 }
  0x8d   :  { %v88_v17 = vrot.slane %v87_v16, 4 }
  0x8f   :  { %v89_v18 = vadd.f32 %v88_v17, %v87_v16 }
  0x91   :  { %v90_v19 = vrot.slane %v89_v18, 2 }
  0x93   :  { %v91_v20 = vadd.f32 %v90_v19, %v89_v18 }
  0x94   :  { %v101_v21 = vpop.xlane.xlu0 %100 }
  0x95   :  { %v102_v22 = vrot.slane %v101_v21, 4  ;;  %v92_v23 = vrot.slane %v91_v20, 1 }
  0x97   :  { %v103_v24 = vadd.f32 %v102_v22, %v101_v21  ;;  %v93_v25 = vadd.f32 %v92_v23, %v91_v20 }
  0x99   :  { %v104_v26 = vrot.slane %v103_v24, 2  ;;  %156 = vpush %v93_v25 }
  0x9b   :  { %v105_v27 = vadd.f32 %v104_v26, %v103_v24 }
  0x9d   :  { %v106_v28 = vrot.slane %v105_v27, 1 }
  0x9f   :  { %v107_v29 = vadd.f32 %v106_v28, %v105_v27 }
  0xa1   :  { %158 = vpush %v107_v29 }
  0xca   :  { %s157_s0 = spop %156 }
  0xd2   :  { %s159_s2 = spop %158 }
  0xd3   :  { %s117_s28 = sadd.f32 1.0, %s159_s2 }
  0xd5   :  { %v118_v30 = vstv %s117_s28 }
  0xd6   :  { %168 = vrcp.f32 %v118_v30  ;;  %v130_v34 = vand.u32 2147483648, %v118_v30  ;;  %v128_v36 = vand.u32 2147483647, %v118_v30  ;;  %vm124_vm1 = vweird.f32 %v118_v30 }
  0xd8   :  { %v131_v38 = vor.u32 1.1754944e-38, %v130_v34  ;;  %vm129_vm3 = vcmp.eq.f32.partialorder %v128_v36, 8.507059e+37 }
  0xdc   :  { %v169_v31 = vpop.eup %168 }
  0xdd   :  { %v120_v32 = vmul.f32 %v169_v31, %v118_v30  ;;  %vm125_vm0 = vweird.f32 %v169_v31 }
  0xde   :  { %vm126_vm2 = vmor %vm124_vm1, %vm125_vm0 }
  0xdf   :  { %v121_v33 = vsub.f32 1.0, %v120_v32 }
  0xe1   :  { %v122_v35 = vmul.f32 %v169_v31, %v121_v33 }
  0xe3   :  { %v123_v37 = vadd.f32 %v169_v31, %v122_v35 }
  0xe5   :  { %v127_v39 = vsel %vm126_vm2, %v169_v31, %v123_v37 }
  0xe6   :  { %v132_v40 = vsel %vm129_vm3, %v131_v38, %v127_v39 }
  0xe7   :  { %160 = vpush %v132_v40 }
 0x118   :  { %s161_s5 = spop %160 }
 0x119   :  { %s134_s6 = smul.f32 %s161_s5, %s157_s0 }
 0x11b   :  { %136 = sst [smem:[#allocation9]] %s134_s6 }
 0x11c   :  { %145 = dma.smem_to_hbm %s265_s7, 16, %s143_s4, [#allocation5]  }
 0x11d   :  { %258 = dma.done.wait [#allocation5], 16  }
 0x11e   :  { %259 = vsyncadd [#allocation5], 4294967280 }
 0x11f   :  { %150 = sfence }
 0x120   :  { %151 = vsyncpa [#allocation4], 1 }
 0x121   :  { %152 = vsyncpa [#allocation7], 1 }
 0x122   :  { %153 = vsyncpa [#allocation5], 1 }

</bundles_post_ra>
